<compile_context>
chip_gen: v7x
topology: tpu7x:2x2x1
jax: 0.10.0
libtpu: 0.0.40
codegen_flags: <defaults>
</compile_context>

<pallas_src>
import functools

import jax
import jax.numpy as jnp
from jax.experimental import pallas as pl
from jax.experimental.pallas import tpu as pltpu


def mlp_kernel(x_ref, w1_ref, b1_ref, w2_ref, b2_ref, o_ref, acc_ref):
    j = pl.program_id(1)                         # hidden-chunk (reduction) axis

    @pl.when(j == 0)
    def _():
        acc_ref[...] = jnp.zeros_like(acc_ref)

    # ---- layer 1 chunk: linear + ReLU, batch on the lane axis -----------------
    # h[o, b] = sum_i w1[o, i] * x[b, i]  (contract the shared last dim; MXU,
    # bf16 operands with f32 accumulation via preferred_element_type).
    h = jax.lax.dot_general(
        w1_ref[...], x_ref[...],
        dimension_numbers=(((1,), (1,)), ((), ())),
        preferred_element_type=jnp.float32,
    )                                                            # (TH, TB) f32
    h = jnp.maximum(h + b1_ref[...], 0.0)                        # f32 bias + ReLU (VPU)

    # ---- layer 2 partial: out_features == 1 -> VPU mul + sublane reduce -------
    acc_ref[...] += jnp.sum(h * w2_ref[...], axis=0, keepdims=True)   # (1, TB) f32

    # ---- finalize: scalar bias + sigmoid, lane-dense store --------------------
    @pl.when(j == pl.num_programs(1) - 1)
    def _():
        z = acc_ref[...] + b2_ref[0, 0]                          # scalar bias from SMEM
        o_ref[...] = jax.nn.sigmoid(z).astype(o_ref.dtype)       # unmasked 128-lane stores


def _round_up(n, m):
    return ((n + m - 1) // m) * m


# Conservative sizing budget safe on every generation (v5e/v6e: 128 MiB physical VMEM,
# v7x: 64 MiB).  On v5e/v6e the budget / limit could be raised to ~96 MiB for bigger tiles.
_VMEM_SIZING_BUDGET = 40 * 1024 * 1024
_VMEM_LIMIT_BYTES = 64 * 1024 * 1024
_WEIGHT_CHUNK_BUDGET = 16 * 1024 * 1024


def _pick_tiles(batch, in_features, hidden, x_bytes, w_bytes, block_b):
    # Hidden chunk: full hidden if its (double-buffered) w1 slab fits the weight budget,
    # otherwise the largest multiple-of-8 chunk that does.
    th = hidden
    while 2 * th * in_features * w_bytes > _WEIGHT_CHUNK_BUDGET and th > 8:
        th = max(8, ((th // 2) // 8) * 8)
    hidden_pad = hidden if th == hidden else _round_up(hidden, th)

    # Batch tile: largest multiple of 128 (capped by block_b) fitting the VMEM budget.
    tb_cap = max(128, (block_b // 128) * 128)          # clamp user block_b to 128 multiple

    def vmem_needed(tb):
        x_tiles = 2 * tb * in_features * x_bytes       # double-buffered x tile
        w1_tiles = 2 * th * in_features * w_bytes      # double-buffered w1 chunk
        small = 2 * 2 * th * 128 * 4                   # (TH,1) b1/w2, lane-padded, 2 bufs
        h_tmp = th * tb * 4                            # (TH,TB) f32 intermediate
        out_acc = 4 * tb * 4                           # accumulator + output block
        return x_tiles + w1_tiles + small + h_tmp + out_acc

    tb = tb_cap
    while tb > 128 and vmem_needed(tb) > _VMEM_SIZING_BUDGET:
        tb -= 128

    # Don't tile past the (128-padded) batch; keep >= 2 batch tiles when possible so
    # dimension_semantics=("parallel", ...) feeds both TensorCores on v7x.
    tb = min(tb, _round_up(batch, 128))
    while _round_up(batch, tb) // tb < 2 and tb > 128:
        tb = max(128, ((tb // 2) // 128) * 128)

    return tb, th, hidden_pad


@functools.partial(jax.jit, static_argnames=("block_b", "use_bf16"))
def neural_net_forward(x, w1, b1, w2, b2, *, block_b=512, use_bf16=True):
    """x: (B, in); w1: (hidden, in); b1: (hidden, 1); w2: (hidden, 1); b2: (1, 1) -> (B, 1)."""
    B, in_features = x.shape
    hidden = w1.shape[0]
    out_dtype = jnp.float32

    # bf16 for the layer-1 matmul operands only (cast in the wrapper so x is DMA'd as bf16).
    mm_dtype = jnp.bfloat16 if use_bf16 else jnp.float32
    x_mm = x.astype(mm_dtype)
    w1_mm = w1.astype(mm_dtype)

    tb, th, hidden_pad = _pick_tiles(
        B, in_features, hidden,
        jnp.dtype(mm_dtype).itemsize, jnp.dtype(mm_dtype).itemsize, block_b)

    b_pad = _round_up(B, tb)
    if b_pad != B:
        x_mm = jnp.pad(x_mm, ((0, b_pad - B), (0, 0)))
    if hidden_pad != hidden:
        # Zero-padded hidden rows contribute ReLU(0)*0 == 0 to the output.
        w1_mm = jnp.pad(w1_mm, ((0, hidden_pad - hidden), (0, 0)))
        b1 = jnp.pad(b1, ((0, hidden_pad - hidden), (0, 0)))
        w2 = jnp.pad(w2, ((0, hidden_pad - hidden), (0, 0)))

    grid = (b_pad // tb, hidden_pad // th)   # (parallel batch tiles, arbitrary hidden chunks)

    out_row = pl.pallas_call(
        mlp_kernel,
        out_shape=jax.ShapeDtypeStruct((1, b_pad), out_dtype),
        grid=grid,
        in_specs=[
            pl.BlockSpec((tb, in_features), lambda i, j: (i, 0)),   # x tile (bf16), per batch
            pl.BlockSpec((th, in_features), lambda i, j: (j, 0)),   # w1 chunk (bf16)
            pl.BlockSpec((th, 1), lambda i, j: (j, 0)),             # b1 chunk (f32)
            pl.BlockSpec((th, 1), lambda i, j: (j, 0)),             # w2 chunk (f32)
            pl.BlockSpec(memory_space=pltpu.MemorySpace.SMEM),      # b2 scalar in SMEM
        ],
        out_specs=pl.BlockSpec((1, tb), lambda i, j: (0, i)),       # lane-dense output slab
        scratch_shapes=[pltpu.VMEM((1, tb), jnp.float32)],          # (1, TB) f32 accumulator
        compiler_params=pltpu.CompilerParams(
            dimension_semantics=("parallel", "arbitrary"),
            vmem_limit_bytes=_VMEM_LIMIT_BYTES,
        ),
    )(x_mm, w1_mm, b1, w2, b2)

    # Layout plumbing only: lane-dense (1, B_pad) slab -> (B, 1).
    return out_row[0, :B][:, None]


def init_params(key, input_size, hidden_size):
    """Deterministic init mimicking nn.Linear's uniform(-1/sqrt(fan_in), 1/sqrt(fan_in)),
    stored in the kernel-friendly layouts described above."""
    k1, k2, k3, k4 = jax.random.split(key, 4)
    bound1 = 1.0 / jnp.sqrt(input_size)
    bound2 = 1.0 / jnp.sqrt(hidden_size)
    w1 = jax.random.uniform(k1, (hidden_size, input_size), jnp.float32, -bound1, bound1)
    b1 = jax.random.uniform(k2, (hidden_size, 1), jnp.float32, -bound1, bound1)
    w2 = jax.random.uniform(k3, (hidden_size, 1), jnp.float32, -bound2, bound2)
    b2 = jax.random.uniform(k4, (1, 1), jnp.float32, -bound2, bound2)
    return w1, b1, w2, b2


if __name__ == "__main__":
    key = jax.random.PRNGKey(0)
    batch, input_size, hidden_size = 8, 16, 32

    kx, kp = jax.random.split(key)
    x = jax.random.normal(kx, (batch, input_size), jnp.float32)
    w1, b1, w2, b2 = init_params(kp, input_size, hidden_size)

    out = neural_net_forward(x, w1, b1, w2, b2)
    jax.block_until_ready(out)
    assert out.shape == (batch, 1)

    # Reference using the same bf16 layer-1 matmul path the kernel takes (tight check).
    h_ref = jnp.maximum(
        jnp.dot(x.astype(jnp.bfloat16), w1.astype(jnp.bfloat16).T,
                preferred_element_type=jnp.float32) + b1.T,
        0.0,
    )
    z_ref = jnp.sum(h_ref * w2[:, 0][None, :], axis=1, keepdims=True) + b2
    ref_bf16 = jax.nn.sigmoid(z_ref)
    assert jnp.allclose(out, ref_bf16, atol=1e-4, rtol=1e-4)

    # Loose sanity check against the pure-f32 PyTorch-equivalent math.
    h_f32 = jnp.maximum(x @ w1.T + b1.T, 0.0)
    ref_f32 = jax.nn.sigmoid(jnp.sum(h_f32 * w2[:, 0][None, :], axis=1, keepdims=True) + b2)
    assert jnp.allclose(out, ref_f32, atol=1e-1)

    print("KERNEL_OK")
</pallas_src>

<mosaic_0001>
module attributes {stable_mosaic.version = 11 : i64} {
  func.func @mlp_kernel(%arg0: i32, %arg1: i32, %arg2: memref<128x16xbf16, #tpu.memory_space<vmem>>, %arg3: memref<32x16xbf16, #tpu.memory_space<vmem>>, %arg4: memref<32x1xf32, #tpu.memory_space<vmem>>, %arg5: memref<32x1xf32, #tpu.memory_space<vmem>>, %arg6: memref<1x1xf32, #tpu.memory_space<smem>>, %arg7: memref<1x128xf32, #tpu.memory_space<vmem>>, %arg8: memref<1x128xf32, #tpu.memory_space<vmem>>) attributes {dimension_semantics = [#tpu.dimension_semantics<parallel>, #tpu.dimension_semantics<arbitrary>], iteration_bounds = array<i64: 1, 1>, scalar_prefetch = 0 : i64, scratch_operands = 1 : i64, tpu.core_type = #tpu.core_type<tc>, window_params = [{transform_indices = @transform_0, window_bounds = array<i64: 128, 16>}, {transform_indices = @transform_1, window_bounds = array<i64: 32, 16>}, {transform_indices = @transform_2, window_bounds = array<i64: 32, 1>}, {transform_indices = @transform_3, window_bounds = array<i64: 32, 1>}, {transform_indices = @transform_4, window_bounds = array<i64: 1, 1>}, {transform_indices = @transform_5, window_bounds = array<i64: 1, 128>}]} {
    %c0_i32 = arith.constant 0 : i32
    %0 = arith.cmpi eq, %arg1, %c0_i32 : i32
    %1 = arith.extui %0 : i1 to i32
    %c0_i32_0 = arith.constant 0 : i32
    %2 = arith.cmpi ne, %1, %c0_i32_0 : i32
    scf.if %2 {
      %cst_16 = arith.constant 0.000000e+00 : f32
      %22 = vector.broadcast %cst_16 : f32 to vector<1x128xf32>
      %c0_17 = arith.constant 0 : index
      %c0_18 = arith.constant 0 : index
      %23 = vector.load %arg8[%c0_17, %c0_18] : memref<1x128xf32, #tpu.memory_space<vmem>>, vector<1x128xf32>
      tpu.vector_store %arg8[%c0_17, %c0_18], %22 {strides = array<i32>} : memref<1x128xf32, #tpu.memory_space<vmem>>, vector<1x128xf32>,
    } else {
    }
    %c0 = arith.constant 0 : index
    %c0_1 = arith.constant 0 : index
    %3 = vector.load %arg3[%c0, %c0_1] : memref<32x16xbf16, #tpu.memory_space<vmem>>, vector<32x16xbf16>
    %c0_2 = arith.constant 0 : index
    %c0_3 = arith.constant 0 : index
    %4 = vector.load %arg2[%c0_2, %c0_3] : memref<128x16xbf16, #tpu.memory_space<vmem>>, vector<128x16xbf16>
    %cst = arith.constant dense<0.000000e+00> : vector<32x128xf32>
    %5 = tpu.matmul %3, %4, %cst {dimension_numbers = #tpu.dot_dimension_numbers<[1], [1], [0], [0], [0, 0, 1, 0], [], []>} : vector<32x16xbf16>, vector<128x16xbf16>, vector<32x128xf32> -> vector<32x128xf32>
    %c0_4 = arith.constant 0 : index
    %c0_5 = arith.constant 0 : index
    %6 = vector.load %arg4[%c0_4, %c0_5] : memref<32x1xf32, #tpu.memory_space<vmem>>, vector<32x1xf32>
    %7 = vector.broadcast %6 : vector<32x1xf32> to vector<32x128xf32>
    %8 = arith.addf %5, %7 : vector<32x128xf32>
    %cst_6 = arith.constant 0.000000e+00 : f32
    %9 = vector.broadcast %cst_6 : f32 to vector<32x128xf32>
    %10 = arith.maximumf %8, %9 : vector<32x128xf32>
    %c0_7 = arith.constant 0 : index
    %c0_8 = arith.constant 0 : index
    %11 = vector.load %arg8[%c0_7, %c0_8] : memref<1x128xf32, #tpu.memory_space<vmem>>, vector<1x128xf32>
    %c0_9 = arith.constant 0 : index
    %c0_10 = arith.constant 0 : index
    %12 = vector.load %arg5[%c0_9, %c0_10] : memref<32x1xf32, #tpu.memory_space<vmem>>, vector<32x1xf32>
    %13 = vector.broadcast %12 : vector<32x1xf32> to vector<32x128xf32>
    %14 = arith.mulf %10, %13 : vector<32x128xf32>
    %cst_11 = arith.constant dense<0.000000e+00> : vector<128xf32>
    %15 = vector.multi_reduction <add>, %14, %cst_11 [0] : vector<32x128xf32> to vector<128xf32>
    %16 = vector.shape_cast %15 : vector<128xf32> to vector<1x128xf32>
    %17 = arith.addf %11, %16 : vector<1x128xf32>
    %c0_12 = arith.constant 0 : index
    %c0_13 = arith.constant 0 : index
    %18 = vector.load %arg8[%c0_12, %c0_13] : memref<1x128xf32, #tpu.memory_space<vmem>>, vector<1x128xf32>
    tpu.vector_store %arg8[%c0_12, %c0_13], %17 {strides = array<i32>} : memref<1x128xf32, #tpu.memory_space<vmem>>, vector<1x128xf32>,
    %c0_i32_14 = arith.constant 0 : i32
    %19 = arith.cmpi eq, %arg1, %c0_i32_14 : i32
    %20 = arith.extui %19 : i1 to i32
    %c0_i32_15 = arith.constant 0 : i32
    %21 = arith.cmpi ne, %20, %c0_i32_15 : i32
    scf.if %21 {
      %c0_16 = arith.constant 0 : index
      %c0_17 = arith.constant 0 : index
      %22 = vector.load %arg8[%c0_16, %c0_17] : memref<1x128xf32, #tpu.memory_space<vmem>>, vector<1x128xf32>
      %c0_18 = arith.constant 0 : index
      %c0_19 = arith.constant 0 : index
      %23 = memref.load %arg6[%c0_18, %c0_19] : memref<1x1xf32, #tpu.memory_space<smem>>
      %24 = vector.broadcast %23 : f32 to vector<1x128xf32>
      %25 = arith.addf %22, %24 : vector<1x128xf32>
      %26 = arith.negf %25 : vector<1x128xf32>
      %27 = math.exp %26 : vector<1x128xf32>
      %cst_20 = arith.constant 1.000000e+00 : f32
      %28 = vector.broadcast %cst_20 : f32 to vector<1x128xf32>
      %29 = arith.addf %28, %27 : vector<1x128xf32>
      %30 = arith.divf %28, %29 : vector<1x128xf32>
      %c0_21 = arith.constant 0 : index
      %c0_22 = arith.constant 0 : index
      %31 = vector.load %arg7[%c0_21, %c0_22] : memref<1x128xf32, #tpu.memory_space<vmem>>, vector<1x128xf32>
      tpu.vector_store %arg7[%c0_21, %c0_22], %30 {strides = array<i32>} : memref<1x128xf32, #tpu.memory_space<vmem>>, vector<1x128xf32>,
    } else {
    }
    return
  }
  func.func @transform_0(%arg0: i32, %arg1: i32) -> (i32, i32) {
    %c0_i32 = arith.constant 0 : i32
    %c0_i32_0 = arith.constant 0 : i32
    return %arg0, %c0_i32 : i32, i32
  }
  func.func @transform_1(%arg0: i32, %arg1: i32) -> (i32, i32) {
    %c0_i32 = arith.constant 0 : i32
    %c0_i32_0 = arith.constant 0 : i32
    return %arg1, %c0_i32 : i32, i32
  }
  func.func @transform_2(%arg0: i32, %arg1: i32) -> (i32, i32) {
    %c0_i32 = arith.constant 0 : i32
    %c0_i32_0 = arith.constant 0 : i32
    return %arg1, %c0_i32 : i32, i32
  }
  func.func @transform_3(%arg0: i32, %arg1: i32) -> (i32, i32) {
    %c0_i32 = arith.constant 0 : i32
    %c0_i32_0 = arith.constant 0 : i32
    return %arg1, %c0_i32 : i32, i32
  }
  func.func @transform_4(%arg0: i32, %arg1: i32) -> (i32, i32) {
    %c0_i32 = arith.constant 0 : i32
    %c0_i32_0 = arith.constant 0 : i32
    %c0_i32_1 = arith.constant 0 : i32
    return %c0_i32, %c0_i32_0 : i32, i32
  }
  func.func @transform_5(%arg0: i32, %arg1: i32) -> (i32, i32) {
    %c0_i32 = arith.constant 0 : i32
    %c0_i32_0 = arith.constant 0 : i32
    return %c0_i32, %arg0 : i32, i32
  }
}

</mosaic_0001>

<bundles_post_ra>
// kernel: neural_net_forward.1
= control target key start
LH: loop header
LB: loop body
LE: loop exit
PB: predicated region body
PF: predicated region fallthrough
CT: control target
= control target key end

     0   :  { %11 = vsyncpa [#allocation5], 0  ;;  %s657_s0 = inlined_call_operand.hbm [shape: bf16[128,16], index: 0, kind: input, shape index: {}]   ;;  %s658_s1 = inlined_call_operand.hbm [shape: bf16[32,16], index: 1, kind: input, shape index: {}]   ;;  %s659_s2 = inlined_call_operand.hbm [shape: f32[32,1], index: 2, kind: input, shape index: {}]   ;;  %s660_s3 = inlined_call_operand.hbm [shape: f32[32,1], index: 3, kind: input, shape index: {}]   ;;  %s661_s4 = inlined_call_operand.<no memory space> [shape: f32[1,1], index: 4, kind: input, shape index: {}]   ;;  %s662_s5 = inlined_call_operand.hbm [shape: f32[1,128], index: 5, kind: output, shape index: {}]  }
   0x1   :  { %12 = vsyncpa [#allocation8], 0 }
   0x2   :  { %13 = vsyncpa [#allocation11], 0 }
   0x3   :  { %14 = vsyncpa [#allocation6], 0  ;;  %s528_s18 = smov [#allocation7]   ;;  %s529_s20 = smov [#allocation4]  }
   0x4   :  { %s32_s19 = sshll.u32 %s528_s18, 4  ;;  %s20_s21 = sshll.u32 %s529_s20, 4  ;;  %s33_s19 = int_to_ptr.vmem [resolvable:$true] %s32_s19  ;;  %s569_s21 = int_to_ptr.vmem [resolvable:$true] %s20_s21 }
   0x5   :  { %s410_s24 = scalar_lea.hbm %s658_s1, 256 }
   0x6   :  { %p411_p0 = scmp.ne.s32.totalorder %s658_s1, %s410_s24  ;;  %p414_p1 = scmp.lt.u32.totalorder %s410_s24, %s658_s1 }
   0x8   :  { %p416_p2 = pnand %p414_p1, %p411_p0 }
   0xa   :  { %419 = shalt.err (!%p416_p2)
}
   0xb   :  { %s420_s29 = scalar_lea.vmem %s33_s19, 256  ;;  %p425_p4 = scmp.lt.s32.totalorder %s33_s19, %s33_s19 }
   0xc   :  { %p421_p3 = scmp.ne.s32.totalorder %s33_s19, %s420_s29  ;;  %p426_p5 = scmp.lt.s32.totalorder %s420_s29, %s420_s29 }
   0xe   :  { %p427_p6 = por %p426_p5, %p425_p4 }
  0x10   :  { %p428_p7 = pnand %p427_p6, %p421_p3 }
  0x12   :  { %431 = shalt.err (!%p428_p7)
}
  0x13   :  { %s530_s30 = smov 64   ;;  %s531_s6 = smov 4  }
  0x14   :  { %38 = dma.hbm_to_vmem [thread:$0]  %s658_s1, 256, %s33_s19, [#allocation8], %s530_s30, %s530_s30, %s531_s6  }
  0x15   :  { %s432_s11 = scalar_lea.hbm %s657_s0, 1024 }
  0x16   :  { %p433_p8 = scmp.ne.s32.totalorder %s657_s0, %s432_s11  ;;  %p436_p9 = scmp.lt.u32.totalorder %s432_s11, %s657_s0 }
  0x18   :  { %p438_p10 = pnand %p436_p9, %p433_p8 }
  0x1a   :  { %441 = shalt.err (!%p438_p10)
}
  0x1b   :  { %s442_s16 = scalar_lea.vmem %s569_s21, 1024  ;;  %p447_p12 = scmp.lt.s32.totalorder %s569_s21, %s569_s21 }
  0x1c   :  { %p443_p11 = scmp.ne.s32.totalorder %s569_s21, %s442_s16  ;;  %p448_p13 = scmp.lt.s32.totalorder %s442_s16, %s442_s16 }
  0x1e   :  { %p449_p0 = por %p448_p13, %p447_p12 }
  0x20   :  { %p450_p1 = pnand %p449_p0, %p443_p11 }
  0x22   :  { %453 = shalt.err (!%p450_p1)
}
  0x23   :  { %26 = dma.hbm_to_vmem [thread:$0]  %s657_s0, 1024, %s569_s21, [#allocation5], %s530_s30, %s530_s30, %s531_s6  }
  0x24   :  { %s532_s18 = smov [#allocation9]   ;;  %s454_s23 = scalar_lea.hbm %s659_s2, 512 }
  0x25   :  { %s44_s19 = sshll.u32 %s532_s18, 4  ;;  %p455_p2 = scmp.ne.s32.totalorder %s659_s2, %s454_s23  ;;  %s45_s19 = int_to_ptr.vmem [resolvable:$true] %s44_s19 }
  0x26   :  { %p458_p3 = scmp.lt.u32.totalorder %s454_s23, %s659_s2 }
  0x28   :  { %p460_p4 = pnand %p458_p3, %p455_p2 }
  0x2a   :  { %463 = shalt.err (!%p460_p4)
}
  0x2b   :  { %s464_s28 = scalar_lea.vmem %s45_s19, 512  ;;  %p469_p6 = scmp.lt.s32.totalorder %s45_s19, %s45_s19 }
  0x2c   :  { %p465_p5 = scmp.ne.s32.totalorder %s45_s19, %s464_s28  ;;  %p470_p7 = scmp.lt.s32.totalorder %s464_s28, %s464_s28 }
  0x2e   :  { %p471_p8 = por %p470_p7, %p469_p6 }
  0x30   :  { %p472_p9 = pnand %p471_p8, %p465_p5 }
  0x32   :  { %475 = shalt.err (!%p472_p9)
}
  0x33   :  { %s533_s0 = smov 128   ;;  %s534_s21 = smov 8  }
  0x34   :  { %50 = dma.hbm_to_vmem [thread:$0]  %s659_s2, 512, %s45_s19, [#allocation8], %s533_s0, %s533_s0, %s534_s21  }
  0x35   :  { %s535_s6 = smov [#allocation10]   ;;  %s476_s10 = scalar_lea.hbm %s660_s3, 512 }
  0x36   :  { %s56_s7 = sshll.u32 %s535_s6, 4  ;;  %p477_p10 = scmp.ne.s32.totalorder %s660_s3, %s476_s10  ;;  %s57_s7 = int_to_ptr.vmem [resolvable:$true] %s56_s7 }
  0x37   :  { %p480_p11 = scmp.lt.u32.totalorder %s476_s10, %s660_s3 }
  0x39   :  { %p482_p12 = pnand %p480_p11, %p477_p10 }
  0x3b   :  { %485 = shalt.err (!%p482_p12)
}
  0x3c   :  { %s486_s15 = scalar_lea.vmem %s57_s7, 512  ;;  %p491_p0 = scmp.lt.s32.totalorder %s57_s7, %s57_s7 }
  0x3d   :  { %p487_p13 = scmp.ne.s32.totalorder %s57_s7, %s486_s15  ;;  %p492_p1 = scmp.lt.s32.totalorder %s486_s15, %s486_s15 }
  0x3f   :  { %p493_p2 = por %p492_p1, %p491_p0 }
  0x41   :  { %p494_p3 = pnand %p493_p2, %p487_p13 }
  0x43   :  { %497 = shalt.err (!%p494_p3)
}
  0x44   :  { %62 = dma.hbm_to_vmem [thread:$0]  %s660_s3, 512, %s57_s7, [#allocation11], %s533_s0, %s533_s0, %s534_s21  }
  0x45   :  { %520 = dma.done.wait [#allocation5], 1024  }
  0x46   :  { %521 = vsyncadd [#allocation5], 4294966272 }
  0x47   :  { %522 = dma.done.wait [#allocation8], 768  }
  0x48   :  { %523 = vsyncadd [#allocation8], 4294966528 }
  0x49   :  { %524 = dma.done.wait [#allocation11], 512  }
  0x4a   :  { %525 = vsyncadd [#allocation11], 4294966784  ;;  %v536_v0 = vmov 0   ;;  %vm177_vm0 = vcmask 130048   ;;  %v396_v1 = vld [vmem:[#allocation4] sm:$0xff]   ;;  %v397_v2 = vld [vmem:[#allocation4 + $0x8] sm:$0xff]   ;;  %v306_v63 = vstv %s661_s4 }
  0x4b   :  { %394 = vset.pattern.permute.xlu0 %v536_v0  ;;  %395 = vset.pattern.permute.xlu1 %v536_v0  ;;  %v185_v3 = vsel %vm177_vm0, %v396_v1, 0  ;;  %v398_v4 = vld [vmem:[#allocation4 + $0x10] sm:$0xff]   ;;  %v188_v5 = vsel %vm177_vm0, %v397_v2, 0  ;;  %v404_v6 = vld [vmem:[#allocation7] sm:$0xff]   ;;  %v104_v9 = vld [vmem:[#allocation9 + $0x8] sm:$0xff]  ;;  %v537_v27 = vmov 0.0  }
  0x4c   :  { %375 = vmatprep.subr.msk.bf16.mxu0 %vm177_vm0, %v396_v1  ;;  %371 = vmatprep.mubr.msk.bf16.mxu0 %vm177_vm0, %v404_v6  ;;  %v103_v7 = vld [vmem:[#allocation9] sm:$0xff]  ;;  %v105_v8 = vld [vmem:[#allocation9 + $0x10] sm:$0xff]  ;;  %v106_v10 = vld [vmem:[#allocation9 + $0x18] sm:$0xff]  ;;  %v191_v11 = vsel %vm177_vm0, %v398_v4, 0  ;;  %82 = vst [vmem:[#allocation2] sm:$0x1] %v537_v27 }
  0x4d   :  { %356 = vmatpush3.bf16.xpose.msra.mxu0 %v185_v3  ;;  %109 = vperm.xlu0 %394, %v103_v7   ;;  %v399_v12 = vld [vmem:[#allocation4 + $0x18] sm:$0xff]   ;;  %v262_v13 = vld [vmem:[#allocation10] sm:$0xff]  ;;  %v264_v15 = vld [vmem:[#allocation10 + $0x10] sm:$0xff]  ;;  %s538_s17 = smov [#allocation12]  }
  0x4e   :  { %376 = vmatprep.subr.msk.bf16.mxu0 %vm177_vm0, %v397_v2  ;;  %119 = vperm.xlu1 %395, %v105_v8   ;;  %v263_v14 = vld [vmem:[#allocation10 + $0x8] sm:$0xff]  ;;  %v265_v16 = vld [vmem:[#allocation10 + $0x18] sm:$0xff]  ;;  %v194_v17 = vsel %vm177_vm0, %v399_v12, 0  ;;  %v400_v18 = vld [vmem:[#allocation4 + $0x20] sm:$0xff]   ;;  %s321_s18 = sshll.u32 %s538_s17, 4  ;;  %s322_s18 = int_to_ptr.vmem [resolvable:$true] %s321_s18 }
  0x4f   :  { %v197_v19 = vsel %vm177_vm0, %v400_v18, 0  ;;  %v401_v20 = vld [vmem:[#allocation4 + $0x28] sm:$0xff]   ;;  %v402_v22 = vld [vmem:[#allocation4 + $0x30] sm:$0xff]   ;;  %v403_v24 = vld [vmem:[#allocation4 + $0x38] sm:$0xff]   ;;  %s498_s19 = scalar_lea.vmem %s322_s18, 16  ;;  %s502_s20 = scalar_lea.vmem %s322_s18, 32 }
  0x50   :  { %v200_v21 = vsel %vm177_vm0, %v401_v20, 0  ;;  %v203_v23 = vsel %vm177_vm0, %v402_v22, 0  ;;  %v206_v25 = vsel %vm177_vm0, %v403_v24, 0  ;;  %v405_v26 = vld [vmem:[#allocation7 + $0x8] sm:$0xff]   ;;  %p499_p4 = scmp.ne.s32.totalorder %s322_s18, %s498_s19  ;;  %p503_p5 = scmp.lt.s32.totalorder %s322_s18, %s322_s18 }
  0x51   :  { %114 = vperm.xlu0 %394, %v104_v9   ;;  %p504_p6 = scmp.lt.s32.totalorder %s502_s20, %s498_s19 }
  0x52   :  { %124 = vperm.xlu1 %395, %v106_v10  }
  0x53   :  { %v261_v60 = vld [vmem:[#allocation2] sm:$0x1]  ;;  %p505_p7 = por %p504_p6, %p503_p5 }
  0x55   :  { %358 = vmatpush3.bf16.xpose.msra.mxu0 %v188_v5  ;;  %268 = vperm.xlu0 %394, %v262_v13   ;;  %p506_p8 = pnand %p505_p7, %p499_p4 }
  0x56   :  { %377 = vmatprep.subr.msk.bf16.mxu0 %vm177_vm0, %v398_v4  ;;  %273 = vperm.xlu1 %395, %v263_v14  }
  0x59   :  { %278 = vperm.xlu0 %394, %v264_v15  }
  0x5a   :  { %283 = vperm.xlu1 %395, %v265_v16  }
  0x5d   :  { %360 = vmatpush3.bf16.xpose.msra.mxu0 %v191_v11 }
  0x5e   :  { %378 = vmatprep.subr.msk.bf16.mxu0 %vm177_vm0, %v399_v12 }
  0x65   :  { %362 = vmatpush3.bf16.xpose.msra.mxu0 %v194_v17 }
  0x66   :  { %379 = vmatprep.subr.msk.bf16.mxu0 %vm177_vm0, %v400_v18 }
  0x6d   :  { %364 = vmatpush3.bf16.xpose.msra.mxu0 %v197_v19 }
  0x6e   :  { %380 = vmatprep.subr.msk.bf16.mxu0 %vm177_vm0, %v401_v20 }
  0x75   :  { %366 = vmatpush3.bf16.xpose.msra.mxu0 %v200_v21 }
  0x76   :  { %381 = vmatprep.subr.msk.bf16.mxu0 %vm177_vm0, %v402_v22 }
  0x7d   :  { %368 = vmatpush3.bf16.xpose.msra.mxu0 %v203_v23 }
  0x7e   :  { %382 = vmatprep.subr.msk.bf16.mxu0 %vm177_vm0, %v403_v24 }
  0x85   :  { %370 = vmatpush3.bf16.xpose.msra.mxu0 %v206_v25 }
  0x8c   :  { %372 = vmatmul.mubr.msk.bf16.vlgmr.msra.gmra.mrb[0].mxu0 %vm177_vm0, %v405_v26 }
  0xcc   :  { %v110_v28 = vpop.permute.xlu0 %109 }
  0xcd   :  { %v120_v29 = vpop.permute.xlu1 %119 }
  0xd0   :  { %v115_v30 = vpop.permute.xlu0 %114 }
  0xd1   :  { %v125_v31 = vpop.permute.xlu1 %124 }
  0xd4   :  { %v269_v37 = vpop.permute.xlu0 %268 }
  0xd5   :  { %v274_v42 = vpop.permute.xlu1 %273 }
  0xd8   :  { %v279_v48 = vpop.permute.xlu0 %278 }
  0xd9   :  { %v284_v51 = vpop.permute.xlu1 %283 }
 0x15f   :  { %v373_v32 = vpop.f32.mrb[0].mxu0 }
 0x160   :  { %v242_v33 = vpop.f32.mrb[1].mxu0  ;;  %v251_v34 = vadd.f32 %v373_v32, %v120_v29 }
 0x161   :  { %v243_v35 = vadd.f32 %v242_v33, %v110_v28  ;;  %v374_v36 = vpop.f32.mrb[2].mxu0 }
 0x162   :  { %v245_v38 = vpop.f32.mrb[3].mxu0  ;;  %v254_v40 = vadd.f32 %v374_v36, %v125_v31  ;;  %v259_v43 = vmax.f32 %v251_v34, 0.0 }
 0x163   :  { %v257_v39 = vmax.f32 %v243_v35, 0.0  ;;  %v246_v41 = vadd.f32 %v245_v38, %v115_v30 }
 0x164   :  { %v260_v46 = vmax.f32 %v254_v40, 0.0  ;;  %v288_v49 = vmul.f32 %v279_v48, %v259_v43 }
 0x165   :  { %v258_v44 = vmax.f32 %v246_v41, 0.0  ;;  %v286_v45 = vmul.f32 %v269_v37, %v257_v39 }
 0x166   :  { %v289_v52 = vmul.f32 %v284_v51, %v260_v46 }
 0x167   :  { %v287_v47 = vmul.f32 %v274_v42, %v258_v44 }
 0x169   :  { %v290_v50 = vadd.f32 %v287_v47, %v286_v45 }
 0x16b   :  { %v291_v53 = vadd.f32 %v290_v50, %v288_v49 }
 0x16d   :  { %v292_v54 = vadd.f32 %v291_v53, %v289_v52 }
 0x16f   :  { %v293_v55 = vrot.slane %v292_v54, 4 }
 0x171   :  { %v294_v56 = vadd.f32 %v293_v55, %v292_v54 }
 0x173   :  { %v295_v57 = vrot.slane %v294_v56, 2 }
 0x175   :  { %v296_v58 = vadd.f32 %v295_v57, %v294_v56 }
 0x177   :  { %v297_v59 = vrot.slane %v296_v58, 1 }
 0x179   :  { %v298_v61 = vadd.f32 %v297_v59, %v296_v58 }
 0x17b   :  { %v299_v62 = vadd.f32 %v298_v61, %v261_v60 }
 0x17d   :  { %300 = vst [vmem:[#allocation2] sm:$0x1] %v299_v62 }
 0x184   :  { %v304_v0 = vld [vmem:[#allocation2] sm:$0x1] }
 0x185   :  { %v307_v1 = vadd.f32 %v306_v63, %v304_v0 }
 0x187   :  { %v344_v2 = vmul.f32 -1.442695, %v307_v1 }
 0x189   :  { %406 = vpow2.f32 %v344_v2 }
 0x193   :  { %v407_v3 = vpop.eup %406 }
 0x194   :  { %v311_v4 = vadd.f32 1.0, %v407_v3 }
 0x196   :  { %408 = vrcp.f32 %v311_v4 }
 0x1a0   :  { %v409_v5 = vpop.eup %408 }
 0x1a1   :  { %314 = vst [vmem:[#allocation12] sm:$0x1] %v409_v5 }
 0x1a2   :  { %509 = shalt.err (!%p506_p8)
}
 0x1a3   :  { %s510_s23 = scalar_lea.hbm %s662_s5, 16 }
 0x1a4   :  { %p511_p9 = scmp.ne.s32.totalorder %s662_s5, %s510_s23  ;;  %p514_p10 = scmp.lt.u32.totalorder %s510_s23, %s662_s5 }
 0x1a6   :  { %p516_p11 = pnand %p514_p10, %p511_p9 }
 0x1a8   :  { %519 = shalt.err (!%p516_p11)
}
 0x1a9   :  { %324 = dma.vmem_to_hbm [thread:$0]  %s322_s18, 16, %s662_s5, [#allocation6]  }
 0x1aa   :  { %526 = dma.done.wait [#allocation6], 16  }
 0x1ab   :  { %527 = vsyncadd [#allocation6], 4294967280 }
 0x1ac   :  { %328 = vsyncpa [#allocation5], 1 }
 0x1ad   :  { %329 = vsyncpa [#allocation8], 1 }
 0x1ae   :  { %330 = vsyncpa [#allocation11], 1 }
 0x1af   :  { %331 = vsyncpa [#allocation6], 1 }

</bundles_post_ra>
